<compile_context>
chip_gen: v7x
topology: tpu7x:2x2x1
jax: 0.10.0
libtpu: 0.0.40
codegen_flags: <defaults>
</compile_context>

<pallas_src>
import functools

import jax
import jax.numpy as jnp
from jax.experimental import pallas as pl
from jax.experimental.pallas import tpu as pltpu


def _round_up(v, m):
    return (v + m - 1) // m * m


def _trilinear_lut_kernel(x_ref, lut_ref, out_ref, *, dim):
    """x_ref: (3, T) channel-planar pixels; lut_ref: (24, d3pad) folded LUT; out_ref: (3, T)."""
    D = dim
    inv_binsize = (D - 1) / 1.000001  # == 1 / binsize; same constant as the CUDA reference

    x = x_ref[...].astype(jnp.float32)   # (3, T), lane-dense
    r = x[0:1, :] * inv_binsize          # (1, T)
    g = x[1:2, :] * inv_binsize
    b = x[2:3, :] * inv_binsize

    rid = jnp.floor(r)
    gid = jnp.floor(g)
    bid = jnp.floor(b)
    # fmod(v, binsize)/binsize == v/binsize - floor(v/binsize) for v >= 0
    rd = r - rid
    gd = g - gid
    bd = b - bid

    id000 = (rid.astype(jnp.int32)
             + gid.astype(jnp.int32) * D
             + bid.astype(jnp.int32) * (D * D))          # (1, T)

    d3pad = lut_ref.shape[1]
    T = x.shape[1]

    # Single 0/1 one-hot; the 8 corner taps are pre-folded into the LUT rows.
    row_ids = jax.lax.broadcasted_iota(jnp.int32, (d3pad, T), 0)
    onehot = (row_ids == id000).astype(jnp.float32)       # (d3pad, T)

    # (24, d3pad) @ (d3pad, T) -> (24, T): all 8 corner values for all 3 channels per pixel,
    # gathered on the MXU with a lane-dense result.
    res = jnp.dot(lut_ref[...], onehot, preferred_element_type=jnp.float32)

    # Rows are ordered ((dr*2 + dg)*2 + db)*3 + c, so the trilinear blend is three lerps on
    # contiguous row slabs (12 -> 6 -> 3 sublanes), algebraically identical to the CUDA 8-weight sum.
    cr = res[0:12, :] + rd * (res[12:24, :] - res[0:12, :])   # r-lerp
    cg = cr[0:6, :] + gd * (cr[6:12, :] - cr[0:6, :])         # g-lerp
    out = cg[0:3, :] + bd * (cg[3:6, :] - cg[0:3, :])         # b-lerp
    out_ref[...] = out.astype(out_ref.dtype)


def trilinear_forward(lut_count, lut, x, *, pix_tile=2048):
    """Equivalent of TrilinearInterpolation.forward(lut_count, lut, x) -> (lut, output)."""
    # TODO(synk): the CUDA extension's lut_count / fix_threshold / k_threshold bookkeeping has no
    # documented effect on the forward output tensor; only the trilinear LUT lookup is reproduced.
    del lut_count
    B, C, H, W = x.shape
    assert C == 3
    D = int(lut.shape[-1])
    d3 = D ** 3
    d3pad = _round_up(d3, 128)

    # Fold the 8 trilinear corner taps into 24 LUT rows:
    #   lut_folded[((dr*2+dg)*2+db)*3 + c, i] = lut_flat[c, i + dr + dg*D + db*D*D]
    # (flat index = r + g*D + b*D*D; rid,gid,bid <= D-2 so the zero-padding is never selected).
    offs = (0, D * D, D, D * D + D, 1, D * D + 1, D + 1, D * D + D + 1)
    lut_flat = lut.reshape(3, d3).astype(jnp.float32)                       # (3, d3)
    rows = [jnp.pad(lut_flat[:, off:], ((0, 0), (0, d3pad - d3 + off))) for off in offs]
    lut_folded = jnp.concatenate(rows, axis=0)                              # (24, d3pad)

    hw = H * W
    # Lane-dense pixel tile (multiple of 128), capped so the (d3pad, tile) one-hot + iota temps
    # stay within a modest VMEM budget on every chip generation (incl. v7x's 64 MiB).
    vmem_cap_tile = max(128, ((8 * 1024 * 1024) // (8 * d3pad)) // 128 * 128)
    tile = min(_round_up(min(pix_tile, hw), 128), vmem_cap_tile)
    n_tiles = pl.cdiv(hw, tile)   # ragged last tile handled by Pallas block masking (no HBM pad copy)

    x3 = x.reshape(B, 3, hw)      # free reshape of NCHW; no transposes anywhere

    grid = (B, n_tiles)
    out = pl.pallas_call(
        functools.partial(_trilinear_lut_kernel, dim=D),
        out_shape=jax.ShapeDtypeStruct((B, 3, hw), x.dtype),
        grid=grid,
        in_specs=[
            pl.BlockSpec((None, 3, tile), lambda b, i: (b, 0, i)),   # channel-planar pixel tile
            pl.BlockSpec((24, d3pad), lambda b, i: (0, 0)),          # folded LUT, fetched once
        ],
        out_specs=pl.BlockSpec((None, 3, tile), lambda b, i: (b, 0, i)),
        compiler_params=pltpu.CompilerParams(
            dimension_semantics=("parallel", "parallel"),
            vmem_limit_bytes=32 * 1024 * 1024,
        ),
    )(x3, lut_folded)

    return lut, out.reshape(B, 3, H, W)


def trilinear_ref(lut, x):
    """Plain-JAX reference of the CUDA trilinear forward (for correctness check)."""
    D = lut.shape[-1]
    inv_binsize = (D - 1) / 1.000001
    r, g, b = x[:, 0], x[:, 1], x[:, 2]
    rt, gt, bt = r * inv_binsize, g * inv_binsize, b * inv_binsize
    rid = jnp.floor(rt).astype(jnp.int32)
    gid = jnp.floor(gt).astype(jnp.int32)
    bid = jnp.floor(bt).astype(jnp.int32)
    rd, gd, bd = rt - rid, gt - gid, bt - bid

    def L(ri, gi, bi):
        return lut[:, bi, gi, ri]  # (3, B, H, W)

    out = (L(rid, gid, bid) * ((1 - rd) * (1 - gd) * (1 - bd))[None]
           + L(rid + 1, gid, bid) * (rd * (1 - gd) * (1 - bd))[None]
           + L(rid, gid + 1, bid) * ((1 - rd) * gd * (1 - bd))[None]
           + L(rid + 1, gid + 1, bid) * (rd * gd * (1 - bd))[None]
           + L(rid, gid, bid + 1) * ((1 - rd) * (1 - gd) * bd)[None]
           + L(rid + 1, gid, bid + 1) * (rd * (1 - gd) * bd)[None]
           + L(rid, gid + 1, bid + 1) * ((1 - rd) * gd * bd)[None]
           + L(rid + 1, gid + 1, bid + 1) * (rd * gd * bd)[None])
    return jnp.transpose(out, (1, 0, 2, 3))


if __name__ == "__main__":
    key = jax.random.PRNGKey(0)
    kx, kl = jax.random.split(key)

    D = 8  # LUT resolution
    B, H, W = 2, 16, 16

    # Deterministic LUT: identity mapping + small perturbation. lut[c, b, g, r].
    coords = jnp.linspace(0.0, 1.0, D, dtype=jnp.float32)
    rgrid = jnp.broadcast_to(coords[None, None, :], (D, D, D))
    ggrid = jnp.broadcast_to(coords[None, :, None], (D, D, D))
    bgrid = jnp.broadcast_to(coords[:, None, None], (D, D, D))
    lut = jnp.stack([rgrid, ggrid, bgrid], axis=0)
    lut = lut + 0.05 * jax.random.normal(kl, lut.shape, dtype=jnp.float32)

    lut_count = jnp.zeros((D, D, D), jnp.float32)
    x = jax.random.uniform(kx, (B, 3, H, W), dtype=jnp.float32)

    lut_out, out = trilinear_forward(lut_count, lut, x)
    out = jax.block_until_ready(out)

    ref = trilinear_ref(lut, x)
    assert out.shape == x.shape and out.dtype == x.dtype
    assert bool(jnp.allclose(out, ref, atol=1e-5, rtol=1e-5)), "mismatch vs reference"
    assert bool(jnp.array_equal(lut_out, lut))
    print("KERNEL_OK")
</pallas_src>

<mosaic_0001>
module attributes {stable_mosaic.version = 11 : i64} {
  func.func @_trilinear_lut_kernel(%arg0: i32, %arg1: i32, %arg2: memref<1x3x256xf32, #tpu.memory_space<vmem>>, %arg3: memref<24x512xf32, #tpu.memory_space<vmem>>, %arg4: memref<1x3x256xf32, #tpu.memory_space<vmem>>) attributes {dimension_semantics = [#tpu.dimension_semantics<parallel>, #tpu.dimension_semantics<parallel>], iteration_bounds = array<i64: 2, 1>, scalar_prefetch = 0 : i64, scratch_operands = 0 : i64, tpu.core_type = #tpu.core_type<tc>, window_params = [{transform_indices = @transform_0, window_bounds = array<i64: 1, 3, 256>}, {pipeline_mode = #tpu.pipeline_mode<synchronous>, transform_indices = @transform_1, window_bounds = array<i64: 24, 512>}, {transform_indices = @transform_2, window_bounds = array<i64: 1, 3, 256>}]} {
    %c0 = arith.constant 0 : index
    %c0_0 = arith.constant 0 : index
    %c0_1 = arith.constant 0 : index
    %0 = vector.load %arg2[%c0, %c0_0, %c0_1] : memref<1x3x256xf32, #tpu.memory_space<vmem>>, vector<1x3x256xf32>
    %1 = vector.shape_cast %0 : vector<1x3x256xf32> to vector<3x256xf32>
    %2 = vector.extract_strided_slice %1 {offsets = [0, 0], sizes = [1, 256], strides = [1, 1]} : vector<3x256xf32> to vector<1x256xf32>
    %cst = arith.constant 6.99999285 : f32
    %3 = vector.broadcast %cst : f32 to vector<1x256xf32>
    %4 = arith.mulf %2, %3 : vector<1x256xf32>
    %5 = vector.extract_strided_slice %1 {offsets = [1, 0], sizes = [1, 256], strides = [1, 1]} : vector<3x256xf32> to vector<1x256xf32>
    %cst_2 = arith.constant 6.99999285 : f32
    %6 = vector.broadcast %cst_2 : f32 to vector<1x256xf32>
    %7 = arith.mulf %5, %6 : vector<1x256xf32>
    %8 = vector.extract_strided_slice %1 {offsets = [2, 0], sizes = [1, 256], strides = [1, 1]} : vector<3x256xf32> to vector<1x256xf32>
    %cst_3 = arith.constant 6.99999285 : f32
    %9 = vector.broadcast %cst_3 : f32 to vector<1x256xf32>
    %10 = arith.mulf %8, %9 : vector<1x256xf32>
    %11 = math.floor %4 : vector<1x256xf32>
    %12 = math.floor %7 : vector<1x256xf32>
    %13 = math.floor %10 : vector<1x256xf32>
    %14 = arith.subf %4, %11 : vector<1x256xf32>
    %15 = arith.subf %7, %12 : vector<1x256xf32>
    %16 = arith.subf %10, %13 : vector<1x256xf32>
    %17 = arith.fptosi %11 : vector<1x256xf32> to vector<1x256xi32>
    %18 = arith.fptosi %12 : vector<1x256xf32> to vector<1x256xi32>
    %c8_i32 = arith.constant 8 : i32
    %19 = vector.broadcast %c8_i32 : i32 to vector<1x256xi32>
    %20 = arith.muli %18, %19 : vector<1x256xi32>
    %21 = arith.addi %17, %20 : vector<1x256xi32>
    %22 = arith.fptosi %13 : vector<1x256xf32> to vector<1x256xi32>
    %c64_i32 = arith.constant 64 : i32
    %23 = vector.broadcast %c64_i32 : i32 to vector<1x256xi32>
    %24 = arith.muli %22, %23 : vector<1x256xi32>
    %25 = arith.addi %21, %24 : vector<1x256xi32>
    %26 = tpu.iota {dimensions = array<i32: 0>} : vector<512x256xi32>
    %27 = vector.broadcast %25 : vector<1x256xi32> to vector<512x256xi32>
    %28 = arith.cmpi eq, %26, %27 : vector<512x256xi32>
    %29 = arith.extui %28 : vector<512x256xi1> to vector<512x256xi32>
    %30 = arith.sitofp %29 : vector<512x256xi32> to vector<512x256xf32>
    %c0_4 = arith.constant 0 : index
    %c0_5 = arith.constant 0 : index
    %31 = vector.load %arg3[%c0_4, %c0_5] : memref<24x512xf32, #tpu.memory_space<vmem>>, vector<24x512xf32>
    %cst_6 = arith.constant dense<0.000000e+00> : vector<24x256xf32>
    %32 = tpu.matmul %31, %30, %cst_6 {dimension_numbers = #tpu.dot_dimension_numbers<[1], [0], [0], [1], [0, 0, 1, 1], [], []>} : vector<24x512xf32>, vector<512x256xf32>, vector<24x256xf32> -> vector<24x256xf32>
    %33 = vector.extract_strided_slice %32 {offsets = [0, 0], sizes = [12, 256], strides = [1, 1]} : vector<24x256xf32> to vector<12x256xf32>
    %34 = vector.extract_strided_slice %32 {offsets = [12, 0], sizes = [12, 256], strides = [1, 1]} : vector<24x256xf32> to vector<12x256xf32>
    %35 = vector.extract_strided_slice %32 {offsets = [0, 0], sizes = [12, 256], strides = [1, 1]} : vector<24x256xf32> to vector<12x256xf32>
    %36 = arith.subf %34, %35 : vector<12x256xf32>
    %37 = vector.broadcast %14 : vector<1x256xf32> to vector<12x256xf32>
    %38 = arith.mulf %37, %36 : vector<12x256xf32>
    %39 = arith.addf %33, %38 : vector<12x256xf32>
    %40 = vector.extract_strided_slice %39 {offsets = [0, 0], sizes = [6, 256], strides = [1, 1]} : vector<12x256xf32> to vector<6x256xf32>
    %41 = vector.extract_strided_slice %39 {offsets = [6, 0], sizes = [6, 256], strides = [1, 1]} : vector<12x256xf32> to vector<6x256xf32>
    %42 = vector.extract_strided_slice %39 {offsets = [0, 0], sizes = [6, 256], strides = [1, 1]} : vector<12x256xf32> to vector<6x256xf32>
    %43 = arith.subf %41, %42 : vector<6x256xf32>
    %44 = vector.broadcast %15 : vector<1x256xf32> to vector<6x256xf32>
    %45 = arith.mulf %44, %43 : vector<6x256xf32>
    %46 = arith.addf %40, %45 : vector<6x256xf32>
    %47 = vector.extract_strided_slice %46 {offsets = [0, 0], sizes = [3, 256], strides = [1, 1]} : vector<6x256xf32> to vector<3x256xf32>
    %48 = vector.extract_strided_slice %46 {offsets = [3, 0], sizes = [3, 256], strides = [1, 1]} : vector<6x256xf32> to vector<3x256xf32>
    %49 = vector.extract_strided_slice %46 {offsets = [0, 0], sizes = [3, 256], strides = [1, 1]} : vector<6x256xf32> to vector<3x256xf32>
    %50 = arith.subf %48, %49 : vector<3x256xf32>
    %51 = vector.broadcast %16 : vector<1x256xf32> to vector<3x256xf32>
    %52 = arith.mulf %51, %50 : vector<3x256xf32>
    %53 = arith.addf %47, %52 : vector<3x256xf32>
    %c0_7 = arith.constant 0 : index
    %c0_8 = arith.constant 0 : index
    %c0_9 = arith.constant 0 : index
    %54 = vector.load %arg4[%c0_7, %c0_8, %c0_9] : memref<1x3x256xf32, #tpu.memory_space<vmem>>, vector<1x3x256xf32>
    %55 = vector.shape_cast %54 : vector<1x3x256xf32> to vector<3x256xf32>
    %56 = vector.shape_cast %53 : vector<3x256xf32> to vector<1x3x256xf32>
    tpu.vector_store %arg4[%c0_7, %c0_8, %c0_9], %56 {strides = array<i32>} : memref<1x3x256xf32, #tpu.memory_space<vmem>>, vector<1x3x256xf32>,
    return
  }
  func.func @transform_0(%arg0: i32, %arg1: i32) -> (i32, i32, i32) {
    %c0_i32 = arith.constant 0 : i32
    %c0_i32_0 = arith.constant 0 : i32
    return %arg0, %c0_i32, %arg1 : i32, i32, i32
  }
  func.func @transform_1(%arg0: i32, %arg1: i32) -> (i32, i32) {
    %c0_i32 = arith.constant 0 : i32
    %c0_i32_0 = arith.constant 0 : i32
    %c0_i32_1 = arith.constant 0 : i32
    return %c0_i32, %c0_i32_0 : i32, i32
  }
  func.func @transform_2(%arg0: i32, %arg1: i32) -> (i32, i32, i32) {
    %c0_i32 = arith.constant 0 : i32
    %c0_i32_0 = arith.constant 0 : i32
    return %arg0, %c0_i32, %arg1 : i32, i32, i32
  }
}

</mosaic_0001>

<bundles_post_ra>
// kernel: tpu_custom_call.1
= control target key start
LH: loop header
LB: loop body
LE: loop exit
PB: predicated region body
PF: predicated region fallthrough
CT: control target
= control target key end

     0   :  { %7 = vsyncpa [#allocation3], 0  ;;  %s1623_s9 = smov 0   ;;  %s1625_s10 = smov 0   ;;  %s2065_s0 = inlined_call_operand.vmem [shape: f32[2,3,256], index: 0, kind: input, shape index: {}]   ;;  %s2066_s1 = inlined_call_operand.hbm [shape: f32[24,512], index: 1, kind: input, shape index: {}]   ;;  %s2067_s2 = inlined_call_operand.vmem [shape: f32[2,3,256], index: 2, kind: output, shape index: {}]  }
   0x1   :  { %s1627_s11 = smov 0  }
   0x2 LB: > { %s1101_s12 = sadd.s32 4294967295, %s1602_s11   ;;  %s25_s13 = sadd.s32 1, %s1598_s10  ;;  %s1602_s11 = sphi %s1627_s11, %s13_s11   ;;  %s1598_s10 = sphi %s1625_s10, %s2077_s10   ;;  %s1594_s9 = sphi %s1623_s9, %s2076_s9  }
   0x3   : > { %p27_p0 = scmp.ge.s32.totalorder %s25_s13, 2  ;;  %p1103_p1 = scmp.ge.s32.totalorder %s1602_s11, 1 }
   0x4   : > { %p107_p2 = scmp.lt.s32.totalorder %s1602_s11, 3  ;;  %p1648_p4 = scmp.eq.s32.totalorder %s1101_s12, 0 }
   0x5   : > { %s2079_s13 = smov (%p27_p0, %s25_s13), 0  ;;  %s1604_s16 = smov [#allocation2]  }
   0x6   : > { %p1644_p3 = pnand %p1103_p1, %p107_p2  ;;  %s119_s17 = sshll.u32 %s1604_s16, 4  ;;  %s120_s17 = int_to_ptr.vmem [resolvable:$true] %s119_s17 }
   0x7   : > { %s2072_s15 = scalar_select %p1648_p4, 1, 0 }
   0x8   : > { %s2071_s14 = scalar_select %p1644_p3, 1, 0 }
   0x9   : > { %p1514_p5 = pneg %p1644_p3  ;;  %s1548_s21 = scalar_lea.hbm %s2066_s1, 1536 }
   0xa   : > { %p1549_p7 = scmp.ne.s32.totalorder %s2066_s1, %s1548_s21  ;;  %p1555_p11 = scmp.lt.u32.totalorder %s1548_s21, %s2066_s1 }
   0xb   : > { %p1656_p6 = pnand %p1648_p4, %p1514_p5 }
   0xd   : > { %p1550_p8 = pneg %p1656_p6 }
   0xf   : > { %p1551_p9 = pnand %p1550_p8, %p1549_p7 }
  0x11   : > { %p1552_p10 = pneg %p1551_p9 }
  0x13   : > { %p1557_p12 = pnand %p1555_p11, %p1552_p10 }
  0x15   : > { %1560 = shalt.err (!%p1557_p12)
}
  0x16   : > { %s1561_s26 = scalar_lea.vmem %s120_s17, 1536  ;;  %p1569_p2 = scmp.lt.s32.totalorder %s120_s17, %s120_s17 }
  0x17   : > { %p1562_p13 = scmp.ne.s32.totalorder %s120_s17, %s1561_s26  ;;  %p1570_p5 = scmp.lt.s32.totalorder %s1561_s26, %s1561_s26 }
  0x19   : > { %p1564_p0 = pnand %p1562_p13, %p1550_p8  ;;  %p1571_p4 = por %p1570_p5, %p1569_p2 }
  0x1b   : > { %p1565_p1 = pneg %p1564_p0 }
  0x1d   : > { %p1572_p3 = pnand %p1571_p4, %p1565_p1 }
  0x1f   : > { %1575 = shalt.err (!%p1572_p3)
}
  0x20   : > { %s1605_s27 = smov 512   ;;  %s1606_s28 = smov 32  }
  0x21   : > { %1517 = dma.hbm_to_vmem [thread:$0]  (!%p1656_p6), %s2066_s1, 1536, %s120_s17, [#allocation3], %s1605_s27, %s1605_s27, %s1606_s28  }
  0x22   : > { %p2074_p7 = scmp.ne.s32.totalorder %s2071_s14, 0 }
  0x23   : > { %p2075_p9 = scmp.ne.s32.totalorder (!%p2074_p7), %s2072_s15, 0 }
  0x24   : > { %148 = sbr.rel (%p2074_p7) target bundleno = 394 (0x18a), region = 28 }
  0x2b   : > { %1589 = dma.done.wait (%p2075_p9), [#allocation3], 1536  }
  0x2c   : > { %1591 = vsyncadd (%p2075_p9), [#allocation3], 4294965760  ;;  %p179_p3 = scmp.lt.s32.totalorder %s1594_s9, 1  ;;  %v677_v2 = vld [vmem:[#allocation2 + $0x8] sm:$0xff]  ;;  %v679_v3 = vld [vmem:[#allocation2 + $0x18] sm:$0xff]  ;;  %v211_v6 = vlaneseq }
  0x2d   : > { %752 = vmatprep.mubr.f32.mxu1 %v677_v2  ;;  %835 = vmatprep.mubr.f32.mxu0 %v679_v3  ;;  %v1607_v28 = vmov 1.0|1.0  }
  0x2e   : > { %s2081_s9 = smov (!%p179_p3, %s1594_s9), 1  ;;  %v1697_v10 = vshrl.u32 %v211_v6, 7 }
  0x2f   : > { %s1372_s3 = sshll.u32 %s2081_s9, 3 }
  0x30   : > { %s186_s6 = scalar_lea.vmem %s2065_s0, %s1372_s3  ;;  %v1700_v14 = vsub.s32 0, %v1697_v10  ;;  %v282_v15 = vsub.s32 4, %v1697_v10  ;;  %v213_v17 = vadd.s32 8, %v1697_v10  ;;  %v244_v20 = vadd.s32 256, %v1697_v10  ;;  %s196_s12 = scalar_lea.vmem %s2067_s2, %s1372_s3 }
  0x31   : > { %v198_v0 = vld [vmem:[%s186_s6] sm:$0x77]  ;;  %v245_v21 = vadd.s32 264, %v1697_v10  ;;  %v214_v24 = vadd.s32 16, %v1697_v10  ;;  %v215_v25 = vadd.s32 24, %v1697_v10  ;;  %v246_v26 = vadd.s32 272, %v1697_v10 }
  0x32   : > { %v1692_v1 = vmul.f32 6.999993, %v198_v0  ;;  %v247_v27 = vadd.s32 280, %v1697_v10  ;;  %v216_v29 = vadd.s32 32, %v1697_v10  ;;  %v217_v30 = vadd.s32 40, %v1697_v10 }
  0x33   : > { %v248_v31 = vadd.s32 288, %v1697_v10  ;;  %v249_v32 = vadd.s32 296, %v1697_v10  ;;  %v218_v33 = vadd.s32 48, %v1697_v10  ;;  %v219_v34 = vadd.s32 56, %v1697_v10 }
  0x34   : > { %v200_v4 = vfloor.f32 %v1692_v1  ;;  %v250_v35 = vadd.s32 304, %v1697_v10  ;;  %v251_v36 = vadd.s32 312, %v1697_v10  ;;  %v220_v37 = vadd.s32 64, %v1697_v10 }
  0x35   : > { %v221_v38 = vadd.s32 72, %v1697_v10  ;;  %v252_v39 = vadd.s32 320, %v1697_v10  ;;  %v253_v40 = vadd.s32 328, %v1697_v10  ;;  %v222_v41 = vadd.s32 80, %v1697_v10 }
  0x36   : > { %v1508_v5 = vtrunc.f32 %v200_v4  ;;  %v223_v42 = vadd.s32 88, %v1697_v10  ;;  %v254_v43 = vadd.s32 336, %v1697_v10  ;;  %v255_v44 = vadd.s32 344, %v1697_v10 }
  0x37   : > { %v224_v45 = vadd.s32 96, %v1697_v10  ;;  %v225_v46 = vadd.s32 104, %v1697_v10  ;;  %v256_v47 = vadd.s32 352, %v1697_v10  ;;  %v257_v48 = vadd.s32 360, %v1697_v10 }
  0x38   : > { %v1509_v7 = vcvt.f32.s32 %v1508_v5  ;;  %v226_v49 = vadd.s32 112, %v1697_v10  ;;  %v227_v50 = vadd.s32 120, %v1697_v10  ;;  %v258_v51 = vadd.s32 368, %v1697_v10 }
  0x39   : > { %v259_v52 = vadd.s32 376, %v1697_v10  ;;  %v228_v53 = vadd.s32 128, %v1697_v10  ;;  %v229_v54 = vadd.s32 136, %v1697_v10  ;;  %v260_v55 = vadd.s32 384, %v1697_v10 }
  0x3a   : > { %v203_v8 = vmul.u32 8, %v1509_v7  ;;  %v207_v9 = vmul.u32 64, %v1509_v7  ;;  %v261_v56 = vadd.s32 392, %v1697_v10  ;;  %v230_v57 = vadd.s32 144, %v1697_v10 }
  0x3b   : > { %v231_v58 = vadd.s32 152, %v1697_v10  ;;  %v262_v59 = vadd.s32 400, %v1697_v10  ;;  %v263_v60 = vadd.s32 408, %v1697_v10  ;;  %v232_v61 = vadd.s32 160, %v1697_v10 }
  0x3c   : > { %v1112_v11 = vrot.slane %v203_v8, 9  ;;  %v1113_v12 = vrot.slane %v207_v9, 10  ;;  %v233_v62 = vadd.s32 168, %v1697_v10  ;;  %v264_v63 = vadd.s32 416, %v1697_v10 }
  0x3d   : > { %v265_v0 = vadd.s32 424, %v1697_v10  ;;  %v234_v2 = vadd.s32 176, %v1697_v10  ;;  %v235_v3 = vadd.s32 184, %v1697_v10  ;;  %v266_v5 = vadd.s32 432, %v1697_v10 }
  0x3e   : > { %v206_v13 = vadd.s32 %v1509_v7, %v1112_v11  ;;  %v267_v6 = vadd.s32 440, %v1697_v10  ;;  %v236_v7 = vadd.s32 192, %v1697_v10  ;;  %v237_v8 = vadd.s32 200, %v1697_v10 }
  0x3f   : > { %v268_v9 = vadd.s32 448, %v1697_v10  ;;  %v269_v11 = vadd.s32 456, %v1697_v10 }
  0x40   : > { %v210_v16 = vadd.s32 %v1113_v12, %v206_v13  ;;  %v238_v12 = vadd.s32 208, %v1697_v10  ;;  %v239_v13 = vadd.s32 216, %v1697_v10 }
  0x42   : > { %v279_v18 = vrot.slane %v210_v16, %v1700_v14  ;;  %v283_v19 = vrot.slane %v210_v16, %v282_v15  ;;  %v270_v16 = vadd.s32 464, %v1697_v10 }
  0x44   : > { %v1710_v22 = vrot.slane %v279_v18, %v1700_v14  ;;  %v1713_v23 = vrot.slane %v283_v19, %v1700_v14  ;;  %v240_v18 = vadd.s32 224, %v1697_v10  ;;  %v241_v19 = vadd.s32 232, %v1697_v10 }
  0x46   : > { %vm293_vm0 = vcmp.eq.s32.totalorder %v1697_v10, %v1713_v23  ;;  %vm295_vm1 = vcmp.eq.s32.totalorder %v213_v17, %v1713_v23  ;;  %vm357_vm2 = vcmp.eq.s32.totalorder %v244_v20, %v1713_v23  ;;  %vm359_vm3 = vcmp.eq.s32.totalorder %v245_v21, %v1713_v23 }
  0x47   : > { %vm1374_vm4 = vmpackc.low %vm295_vm1, %vm293_vm0  ;;  %vm292_vm5 = vcmp.eq.s32.totalorder %v1697_v10, %v1710_v22  ;;  %vm294_vm6 = vcmp.eq.s32.totalorder %v213_v17, %v1710_v22  ;;  %vm356_vm7 = vcmp.eq.s32.totalorder %v244_v20, %v1710_v22  ;;  %vm358_vm8 = vcmp.eq.s32.totalorder %v245_v21, %v1710_v22 }
  0x48   : > { %1375 = vmatprep.subr.msk.bf16.mxu1 %vm1374_vm4, %v1607_v28  ;;  %vm1438_vm9 = vmpackc.low %vm359_vm3, %vm357_vm2  ;;  %vm297_vm10 = vcmp.eq.s32.totalorder %v214_v24, %v1713_v23  ;;  %vm299_vm11 = vcmp.eq.s32.totalorder %v215_v25, %v1713_v23  ;;  %vm361_vm13 = vcmp.eq.s32.totalorder %v246_v26, %v1713_v23  ;;  %vm363_vm14 = vcmp.eq.s32.totalorder %v247_v27, %v1713_v23 }
  0x49   : > { %1439 = vmatprep.subr.msk.bf16.mxu0 %vm1438_vm9, %v1607_v28  ;;  %vm1376_vm12 = vmpackc.low %vm294_vm6, %vm292_vm5  ;;  %vm296_vm0 = vcmp.eq.s32.totalorder %v214_v24, %v1710_v22  ;;  %vm298_vm1 = vcmp.eq.s32.totalorder %v215_v25, %v1710_v22  ;;  %vm360_vm3 = vcmp.eq.s32.totalorder %v246_v26, %v1710_v22  ;;  %vm362_vm4 = vcmp.eq.s32.totalorder %v247_v27, %v1710_v22 }
  0x4a   : > { %1377 = vmatpush1.bf16.msk.msra.mxu1 %vm1376_vm12, %v1607_v28  ;;  %vm1440_vm15 = vmpackc.low %vm358_vm8, %vm356_vm7  ;;  %vm301_vm6 = vcmp.eq.s32.totalorder %v216_v29, %v1713_v23  ;;  %vm303_vm7 = vcmp.eq.s32.totalorder %v217_v30, %v1713_v23  ;;  %vm365_vm9 = vcmp.eq.s32.totalorder %v248_v31, %v1713_v23  ;;  %vm300_vm12 = vcmp.eq.s32.totalorder %v216_v29, %v1710_v22  ;;  %v678_v29 = vld [vmem:[#allocation2 + $0x10] sm:$0xff] }
  0x4b   : > { %1441 = vmatpush1.bf16.msk.msra.mxu0 %vm1440_vm15, %v1607_v28  ;;  %vm1378_vm2 = vmpackc.low %vm299_vm11, %vm297_vm10  ;;  %vm367_vm10 = vcmp.eq.s32.totalorder %v249_v32, %v1713_v23  ;;  %vm364_vm15 = vcmp.eq.s32.totalorder %v248_v31, %v1710_v22  ;;  %v271_v17 = vadd.s32 472, %v1697_v10  ;;  %v272_v20 = vadd.s32 480, %v1697_v10  ;;  %v683_v31 = vld [vmem:[#allocation2 + $0x38] sm:$0xff] }
  0x4c   : > { %1379 = vmatprep.subr.msk.bf16.mxu1 %vm1378_vm2, %v1607_v28  ;;  %vm1442_vm5 = vmpackc.low %vm363_vm14, %vm361_vm13  ;;  %vm302_vm13 = vcmp.eq.s32.totalorder %v217_v30, %v1710_v22  ;;  %vm305_vm2 = vcmp.eq.s32.totalorder %v218_v33, %v1713_v23  ;;  %v273_v21 = vadd.s32 488, %v1697_v10  ;;  %v242_v24 = vadd.s32 240, %v1697_v10  ;;  %v681_v30 = vld [vmem:[#allocation2 + $0x28] sm:$0xff] }
  0x4d   : > { %1443 = vmatprep.subr.msk.bf16.mxu0 %vm1442_vm5, %v1607_v28  ;;  %vm1380_vm8 = vmpackc.low %vm298_vm1, %vm296_vm0  ;;  %vm366_vm0 = vcmp.eq.s32.totalorder %v249_v32, %v1710_v22  ;;  %vm369_vm5 = vcmp.eq.s32.totalorder %v250_v35, %v1713_v23  ;;  %v243_v25 = vadd.s32 248, %v1697_v10  ;;  %v274_v26 = vadd.s32 496, %v1697_v10  ;;  %v680_v32 = vld [vmem:[#allocation2 + $0x20] sm:$0xff] }
  0x4e   : > { %1381 = vmatpush1.bf16.msk.msra.mxu1 %vm1380_vm8, %v1607_v28  ;;  %vm1444_vm11 = vmpackc.low %vm362_vm4, %vm360_vm3  ;;  %vm307_vm3 = vcmp.eq.s32.totalorder %v219_v34, %v1713_v23  ;;  %vm304_vm8 = vcmp.eq.s32.totalorder %v218_v33, %v1710_v22  ;;  %v275_v27 = vadd.s32 504, %v1697_v10  ;;  %v685_v33 = vld [vmem:[#allocation2 + $0x48] sm:$0xff] }
  0x4f   : > { %1445 = vmatpush1.bf16.msk.msra.mxu0 %vm1444_vm11, %v1607_v28  ;;  %vm1382_vm14 = vmpackc.low %vm303_vm7, %vm301_vm6  ;;  %vm371_vm6 = vcmp.eq.s32.totalorder %v251_v36, %v1713_v23  ;;  %vm368_vm11 = vcmp.eq.s32.totalorder %v250_v35, %v1710_v22  ;;  %v684_v35 = vld [vmem:[#allocation2 + $0x40] sm:$0xff] }
  0x50   : > { %1383 = vmatprep.subr.msk.bf16.mxu1 %vm1382_vm14, %v1607_v28  ;;  %vm1446_vm1 = vmpackc.low %vm367_vm10, %vm365_vm9  ;;  %vm306_vm9 = vcmp.eq.s32.totalorder %v219_v34, %v1710_v22  ;;  %vm309_vm14 = vcmp.eq.s32.totalorder %v220_v37, %v1713_v23  ;;  %v687_v34 = vld [vmem:[#allocation2 + $0x58] sm:$0xff] }
  0x51   : > { %1447 = vmatprep.subr.msk.bf16.mxu0 %vm1446_vm1, %v1607_v28  ;;  %vm1384_vm4 = vmpackc.low %vm302_vm13, %vm300_vm12  ;;  %vm370_vm12 = vcmp.eq.s32.totalorder %v251_v36, %v1710_v22  ;;  %vm373_vm1 = vcmp.eq.s32.totalorder %v252_v39, %v1713_v23  ;;  %v686_v36 = vld [vmem:[#allocation2 + $0x50] sm:$0xff] }
  0x52   : > { %1385 = vmatpush1.bf16.msk.msra.mxu1 %vm1384_vm4, %v1607_v28  ;;  %vm1448_vm7 = vmpackc.low %vm366_vm0, %vm364_vm15  ;;  %vm311_vm15 = vcmp.eq.s32.totalorder %v221_v38, %v1713_v23  ;;  %vm308_vm4 = vcmp.eq.s32.totalorder %v220_v37, %v1710_v22  ;;  %v2030_v37 = vsub.f32 %v1692_v1, %v200_v4 }
  0x53   : > { %1449 = vmatpush1.bf16.msk.msra.mxu0 %vm1448_vm7, %v1607_v28  ;;  %vm1386_vm10 = vmpackc.low %vm307_vm3, %vm305_vm2  ;;  %vm375_vm2 = vcmp.eq.s32.totalorder %v253_v40, %v1713_v23  ;;  %vm372_vm7 = vcmp.eq.s32.totalorder %v252_v39, %v1710_v22 }
  0x54   : > { %1387 = vmatprep.subr.msk.bf16.mxu1 %vm1386_vm10, %v1607_v28  ;;  %vm1450_vm13 = vmpackc.low %vm371_vm6, %vm369_vm5  ;;  %vm310_vm5 = vcmp.eq.s32.totalorder %v221_v38, %v1710_v22  ;;  %vm313_vm10 = vcmp.eq.s32.totalorder %v222_v41, %v1713_v23 }
  0x55   : > { %1451 = vmatprep.subr.msk.bf16.mxu0 %vm1450_vm13, %v1607_v28  ;;  %vm1388_vm0 = vmpackc.low %vm306_vm9, %vm304_vm8  ;;  %vm374_vm8 = vcmp.eq.s32.totalorder %v253_v40, %v1710_v22  ;;  %vm377_vm13 = vcmp.eq.s32.totalorder %v254_v43, %v1713_v23 }
  0x56   : > { %1389 = vmatpush1.bf16.msk.msra.mxu1 %vm1388_vm0, %v1607_v28  ;;  %vm1452_vm3 = vmpackc.low %vm370_vm12, %vm368_vm11  ;;  %vm315_vm11 = vcmp.eq.s32.totalorder %v223_v42, %v1713_v23  ;;  %vm312_vm0 = vcmp.eq.s32.totalorder %v222_v41, %v1710_v22 }
  0x57   : > { %1453 = vmatpush1.bf16.msk.msra.mxu0 %vm1452_vm3, %v1607_v28  ;;  %vm1390_vm6 = vmpackc.low %vm311_vm15, %vm309_vm14  ;;  %vm379_vm14 = vcmp.eq.s32.totalorder %v255_v44, %v1713_v23  ;;  %vm376_vm3 = vcmp.eq.s32.totalorder %v254_v43, %v1710_v22 }
  0x58   : > { %1391 = vmatprep.subr.msk.bf16.mxu1 %vm1390_vm6, %v1607_v28  ;;  %vm1454_vm9 = vmpackc.low %vm375_vm2, %vm373_vm1  ;;  %vm314_vm1 = vcmp.eq.s32.totalorder %v223_v42, %v1710_v22  ;;  %vm317_vm6 = vcmp.eq.s32.totalorder %v224_v45, %v1713_v23 }
  0x59   : > { %1455 = vmatprep.subr.msk.bf16.mxu0 %vm1454_vm9, %v1607_v28  ;;  %vm1392_vm12 = vmpackc.low %vm310_vm5, %vm308_vm4  ;;  %vm378_vm4 = vcmp.eq.s32.totalorder %v255_v44, %v1710_v22  ;;  %vm381_vm9 = vcmp.eq.s32.totalorder %v256_v47, %v1713_v23  ;;  %v877_v44 = vrot.slane %v2030_v37, %v1700_v14 }
  0x5a   : > { %1393 = vmatpush1.bf16.msk.msra.mxu1 %vm1392_vm12, %v1607_v28  ;;  %vm1456_vm15 = vmpackc.low %vm374_vm8, %vm372_vm7  ;;  %vm319_vm7 = vcmp.eq.s32.totalorder %v225_v46, %v1713_v23  ;;  %vm316_vm12 = vcmp.eq.s32.totalorder %v224_v45, %v1710_v22 }
  0x5b   : > { %1457 = vmatpush1.bf16.msk.msra.mxu0 %vm1456_vm15, %v1607_v28  ;;  %vm1394_vm2 = vmpackc.low %vm315_vm11, %vm313_vm10  ;;  %vm383_vm10 = vcmp.eq.s32.totalorder %v257_v48, %v1713_v23  ;;  %vm380_vm15 = vcmp.eq.s32.totalorder %v256_v47, %v1710_v22  ;;  %v881_v47 = vrot.slane %v2030_v37, %v282_v15 }
  0x5c   : > { %1395 = vmatprep.subr.msk.bf16.mxu1 %vm1394_vm2, %v1607_v28  ;;  %vm1458_vm5 = vmpackc.low %vm379_vm14, %vm377_vm13  ;;  %vm318_vm13 = vcmp.eq.s32.totalorder %v225_v46, %v1710_v22  ;;  %vm321_vm2 = vcmp.eq.s32.totalorder %v226_v49, %v1713_v23 }
  0x5d   : > { %1459 = vmatprep.subr.msk.bf16.mxu0 %vm1458_vm5, %v1607_v28  ;;  %vm1396_vm8 = vmpackc.low %vm314_vm1, %vm312_vm0  ;;  %vm382_vm0 = vcmp.eq.s32.totalorder %v257_v48, %v1710_v22  ;;  %vm385_vm5 = vcmp.eq.s32.totalorder %v258_v51, %v1713_v23 }
  0x5e   : > { %1397 = vmatpush1.bf16.msk.msra.mxu1 %vm1396_vm8, %v1607_v28  ;;  %vm1460_vm11 = vmpackc.low %vm378_vm4, %vm376_vm3  ;;  %vm323_vm3 = vcmp.eq.s32.totalorder %v227_v50, %v1713_v23  ;;  %vm320_vm8 = vcmp.eq.s32.totalorder %v226_v49, %v1710_v22 }
  0x5f   : > { %1461 = vmatpush1.bf16.msk.msra.mxu0 %vm1460_vm11, %v1607_v28  ;;  %vm1398_vm14 = vmpackc.low %vm319_vm7, %vm317_vm6  ;;  %vm387_vm6 = vcmp.eq.s32.totalorder %v259_v52, %v1713_v23  ;;  %vm384_vm11 = vcmp.eq.s32.totalorder %v258_v51, %v1710_v22 }
  0x60   : > { %1399 = vmatprep.subr.msk.bf16.mxu1 %vm1398_vm14, %v1607_v28  ;;  %vm1462_vm1 = vmpackc.low %vm383_vm10, %vm381_vm9  ;;  %vm322_vm9 = vcmp.eq.s32.totalorder %v227_v50, %v1710_v22  ;;  %vm325_vm14 = vcmp.eq.s32.totalorder %v228_v53, %v1713_v23 }
  0x61   : > { %1463 = vmatprep.subr.msk.bf16.mxu0 %vm1462_vm1, %v1607_v28  ;;  %vm1400_vm4 = vmpackc.low %vm318_vm13, %vm316_vm12  ;;  %vm386_vm12 = vcmp.eq.s32.totalorder %v259_v52, %v1710_v22  ;;  %vm389_vm1 = vcmp.eq.s32.totalorder %v260_v55, %v1713_v23 }
  0x62   : > { %1401 = vmatpush1.bf16.msk.msra.mxu1 %vm1400_vm4, %v1607_v28  ;;  %vm1464_vm7 = vmpackc.low %vm382_vm0, %vm380_vm15  ;;  %vm327_vm15 = vcmp.eq.s32.totalorder %v229_v54, %v1713_v23  ;;  %vm324_vm4 = vcmp.eq.s32.totalorder %v228_v53, %v1710_v22 }
  0x63   : > { %1465 = vmatpush1.bf16.msk.msra.mxu0 %vm1464_vm7, %v1607_v28  ;;  %vm1402_vm10 = vmpackc.low %vm323_vm3, %vm321_vm2  ;;  %vm391_vm2 = vcmp.eq.s32.totalorder %v261_v56, %v1713_v23  ;;  %vm388_vm7 = vcmp.eq.s32.totalorder %v260_v55, %v1710_v22 }
  0x64   : > { %1403 = vmatprep.subr.msk.bf16.mxu1 %vm1402_vm10, %v1607_v28  ;;  %vm1466_vm13 = vmpackc.low %vm387_vm6, %vm385_vm5  ;;  %vm326_vm5 = vcmp.eq.s32.totalorder %v229_v54, %v1710_v22  ;;  %vm329_vm10 = vcmp.eq.s32.totalorder %v230_v57, %v1713_v23  ;;  %v887_v54 = vrot.slane %v877_v44, %v1700_v14 }
  0x65   : > { %1467 = vmatprep.subr.msk.bf16.mxu0 %vm1466_vm13, %v1607_v28  ;;  %vm1404_vm0 = vmpackc.low %vm322_vm9, %vm320_vm8  ;;  %vm390_vm8 = vcmp.eq.s32.totalorder %v261_v56, %v1710_v22  ;;  %vm393_vm13 = vcmp.eq.s32.totalorder %v262_v59, %v1713_v23 }
  0x66   : > { %1405 = vmatpush1.bf16.msk.msra.mxu1 %vm1404_vm0, %v1607_v28  ;;  %vm1468_vm3 = vmpackc.low %vm386_vm12, %vm384_vm11  ;;  %vm331_vm11 = vcmp.eq.s32.totalorder %v231_v58, %v1713_v23  ;;  %vm328_vm0 = vcmp.eq.s32.totalorder %v230_v57, %v1710_v22 }
  0x67   : > { %1469 = vmatpush1.bf16.msk.msra.mxu0 %vm1468_vm3, %v1607_v28  ;;  %vm1406_vm6 = vmpackc.low %vm327_vm15, %vm325_vm14  ;;  %vm395_vm14 = vcmp.eq.s32.totalorder %v263_v60, %v1713_v23  ;;  %vm392_vm3 = vcmp.eq.s32.totalorder %v262_v59, %v1710_v22  ;;  %v891_v59 = vrot.slane %v881_v47, %v1700_v14 }
  0x68   : > { %1407 = vmatprep.subr.msk.bf16.mxu1 %vm1406_vm6, %v1607_v28  ;;  %vm1470_vm9 = vmpackc.low %vm391_vm2, %vm389_vm1  ;;  %vm330_vm1 = vcmp.eq.s32.totalorder %v231_v58, %v1710_v22  ;;  %vm333_vm6 = vcmp.eq.s32.totalorder %v232_v61, %v1713_v23 }
  0x69   : > { %1471 = vmatprep.subr.msk.bf16.mxu0 %vm1470_vm9, %v1607_v28  ;;  %vm1408_vm12 = vmpackc.low %vm326_vm5, %vm324_vm4  ;;  %vm394_vm4 = vcmp.eq.s32.totalorder %v263_v60, %v1710_v22  ;;  %vm397_vm9 = vcmp.eq.s32.totalorder %v264_v63, %v1713_v23 }
  0x6a   : > { %1409 = vmatpush1.bf16.msk.msra.mxu1 %vm1408_vm12, %v1607_v28  ;;  %vm1472_vm15 = vmpackc.low %vm390_vm8, %vm388_vm7  ;;  %vm335_vm7 = vcmp.eq.s32.totalorder %v233_v62, %v1713_v23  ;;  %vm332_vm12 = vcmp.eq.s32.totalorder %v232_v61, %v1710_v22 }
  0x6b   : > { %1473 = vmatpush1.bf16.msk.msra.mxu0 %vm1472_vm15, %v1607_v28  ;;  %vm1410_vm2 = vmpackc.low %vm331_vm11, %vm329_vm10  ;;  %vm399_vm10 = vcmp.eq.s32.totalorder %v265_v0, %v1713_v23  ;;  %vm396_vm15 = vcmp.eq.s32.totalorder %v264_v63, %v1710_v22 }
  0x6c   : > { %1411 = vmatprep.subr.msk.bf16.mxu1 %vm1410_vm2, %v1607_v28  ;;  %vm1474_vm5 = vmpackc.low %vm395_vm14, %vm393_vm13  ;;  %vm334_vm13 = vcmp.eq.s32.totalorder %v233_v62, %v1710_v22  ;;  %vm337_vm2 = vcmp.eq.s32.totalorder %v234_v2, %v1713_v23 }
  0x6d   : > { %1475 = vmatprep.subr.msk.bf16.mxu0 %vm1474_vm5, %v1607_v28  ;;  %vm1412_vm8 = vmpackc.low %vm330_vm1, %vm328_vm0  ;;  %vm398_vm0 = vcmp.eq.s32.totalorder %v265_v0, %v1710_v22  ;;  %vm401_vm5 = vcmp.eq.s32.totalorder %v266_v5, %v1713_v23 }
  0x6e   : > { %1413 = vmatpush1.bf16.msk.msra.mxu1 %vm1412_vm8, %v1607_v28  ;;  %vm1476_vm11 = vmpackc.low %vm394_vm4, %vm392_vm3  ;;  %vm339_vm3 = vcmp.eq.s32.totalorder %v235_v3, %v1713_v23  ;;  %vm336_vm8 = vcmp.eq.s32.totalorder %v234_v2, %v1710_v22 }
  0x6f   : > { %1477 = vmatpush1.bf16.msk.msra.mxu0 %vm1476_vm11, %v1607_v28  ;;  %vm1414_vm14 = vmpackc.low %vm335_vm7, %vm333_vm6  ;;  %vm403_vm6 = vcmp.eq.s32.totalorder %v267_v6, %v1713_v23  ;;  %vm400_vm11 = vcmp.eq.s32.totalorder %v266_v5, %v1710_v22 }
  0x70   : > { %1415 = vmatprep.subr.msk.bf16.mxu1 %vm1414_vm14, %v1607_v28  ;;  %vm1478_vm1 = vmpackc.low %vm399_vm10, %vm397_vm9  ;;  %vm338_vm9 = vcmp.eq.s32.totalorder %v235_v3, %v1710_v22  ;;  %vm341_vm14 = vcmp.eq.s32.totalorder %v236_v7, %v1713_v23  ;;  %v926_v3 = vsub.s32 1, %v1697_v10 }
  0x71   : > { %1479 = vmatprep.subr.msk.bf16.mxu0 %vm1478_vm1, %v1607_v28  ;;  %vm1416_vm4 = vmpackc.low %vm334_vm13, %vm332_vm12  ;;  %vm402_vm12 = vcmp.eq.s32.totalorder %v267_v6, %v1710_v22  ;;  %vm405_vm1 = vcmp.eq.s32.totalorder %v268_v9, %v1713_v23 }
  0x72   : > { %1417 = vmatpush1.bf16.msk.msra.mxu1 %vm1416_vm4, %v1607_v28  ;;  %vm1480_vm7 = vmpackc.low %vm398_vm0, %vm396_vm15  ;;  %vm343_vm15 = vcmp.eq.s32.totalorder %v237_v8, %v1713_v23  ;;  %vm340_vm4 = vcmp.eq.s32.totalorder %v236_v7, %v1710_v22  ;;  %v927_v14 = vrot.slane %v2030_v37, %v926_v3 }
  0x73   : > { %1481 = vmatpush1.bf16.msk.msra.mxu0 %vm1480_vm7, %v1607_v28  ;;  %vm1418_vm10 = vmpackc.low %vm339_vm3, %vm337_vm2  ;;  %vm407_vm2 = vcmp.eq.s32.totalorder %v269_v11, %v1713_v23  ;;  %vm404_vm7 = vcmp.eq.s32.totalorder %v268_v9, %v1710_v22 }
  0x74   : > { %1419 = vmatprep.subr.msk.bf16.mxu1 %vm1418_vm10, %v1607_v28  ;;  %vm1482_vm13 = vmpackc.low %vm403_vm6, %vm401_vm5  ;;  %vm342_vm5 = vcmp.eq.s32.totalorder %v237_v8, %v1710_v22  ;;  %vm345_vm10 = vcmp.eq.s32.totalorder %v238_v12, %v1713_v23  ;;  %v930_v8 = vsub.s32 5, %v1697_v10 }
  0x75   : > { %1483 = vmatprep.subr.msk.bf16.mxu0 %vm1482_vm13, %v1607_v28  ;;  %vm1420_vm0 = vmpackc.low %vm338_vm9, %vm336_vm8  ;;  %vm406_vm8 = vcmp.eq.s32.totalorder %v269_v11, %v1710_v22  ;;  %vm409_vm13 = vcmp.eq.s32.totalorder %v270_v16, %v1713_v23 }
  0x76   : > { %1421 = vmatpush1.bf16.msk.msra.mxu1 %vm1420_vm0, %v1607_v28  ;;  %vm1484_vm3 = vmpackc.low %vm402_vm12, %vm400_vm11  ;;  %vm347_vm11 = vcmp.eq.s32.totalorder %v239_v13, %v1713_v23  ;;  %vm344_vm0 = vcmp.eq.s32.totalorder %v238_v12, %v1710_v22 }
  0x77   : > { %1485 = vmatpush1.bf16.msk.msra.mxu0 %vm1484_vm3, %v1607_v28  ;;  %vm1422_vm6 = vmpackc.low %vm343_vm15, %vm341_vm14  ;;  %vm411_vm14 = vcmp.eq.s32.totalorder %v271_v17, %v1713_v23  ;;  %vm408_vm3 = vcmp.eq.s32.totalorder %v270_v16, %v1710_v22 }
  0x78   : > { %1423 = vmatprep.subr.msk.bf16.mxu1 %vm1422_vm6, %v1607_v28  ;;  %vm1486_vm9 = vmpackc.low %vm407_vm2, %vm405_vm1  ;;  %vm346_vm1 = vcmp.eq.s32.totalorder %v239_v13, %v1710_v22  ;;  %vm349_vm6 = vcmp.eq.s32.totalorder %v240_v18, %v1713_v23 }
  0x79   : > { %1487 = vmatprep.subr.msk.bf16.mxu0 %vm1486_vm9, %v1607_v28  ;;  %vm1424_vm12 = vmpackc.low %vm342_vm5, %vm340_vm4  ;;  %vm410_vm4 = vcmp.eq.s32.totalorder %v271_v17, %v1710_v22  ;;  %vm413_vm9 = vcmp.eq.s32.totalorder %v272_v20, %v1713_v23 }
  0x7a   : > { %1425 = vmatpush1.bf16.msk.msra.mxu1 %vm1424_vm12, %v1607_v28  ;;  %vm1488_vm15 = vmpackc.low %vm406_vm8, %vm404_vm7  ;;  %vm351_vm7 = vcmp.eq.s32.totalorder %v241_v19, %v1713_v23  ;;  %vm348_vm12 = vcmp.eq.s32.totalorder %v240_v18, %v1710_v22 }
  0x7b   : > { %1489 = vmatpush1.bf16.msk.msra.mxu0 %vm1488_vm15, %v1607_v28  ;;  %vm1426_vm2 = vmpackc.low %vm347_vm11, %vm345_vm10  ;;  %vm415_vm10 = vcmp.eq.s32.totalorder %v273_v21, %v1713_v23  ;;  %vm412_vm15 = vcmp.eq.s32.totalorder %v272_v20, %v1710_v22 }
  0x7c   : > { %1427 = vmatprep.subr.msk.bf16.mxu1 %vm1426_vm2, %v1607_v28  ;;  %vm1490_vm5 = vmpackc.low %vm411_vm14, %vm409_vm13  ;;  %vm350_vm13 = vcmp.eq.s32.totalorder %v241_v19, %v1710_v22  ;;  %vm353_vm2 = vcmp.eq.s32.totalorder %v242_v24, %v1713_v23  ;;  %v931_v19 = vrot.slane %v2030_v37, %v930_v8 }
  0x7d   : > { %1491 = vmatprep.subr.msk.bf16.mxu0 %vm1490_vm5, %v1607_v28  ;;  %vm1428_vm8 = vmpackc.low %vm346_vm1, %vm344_vm0  ;;  %vm414_vm0 = vcmp.eq.s32.totalorder %v273_v21, %v1710_v22  ;;  %vm417_vm5 = vcmp.eq.s32.totalorder %v274_v26, %v1713_v23 }
  0x7e   : > { %1429 = vmatpush1.bf16.msk.msra.mxu1 %vm1428_vm8, %v1607_v28  ;;  %vm1492_vm11 = vmpackc.low %vm410_vm4, %vm408_vm3  ;;  %vm355_vm3 = vcmp.eq.s32.totalorder %v243_v25, %v1713_v23  ;;  %vm419_vm8 = vcmp.eq.s32.totalorder %v275_v27, %v1713_v23  ;;  %v676_v23 = vld [vmem:[#allocation2] sm:$0xff] }
  0x7f   : > { %1493 = vmatpush1.bf16.msk.msra.mxu0 %vm1492_vm11, %v1607_v28  ;;  %vm1430_vm14 = vmpackc.low %vm351_vm7, %vm349_vm6  ;;  %vm352_vm7 = vcmp.eq.s32.totalorder %v242_v24, %v1710_v22  ;;  %vm354_vm11 = vcmp.eq.s32.totalorder %v243_v25, %v1710_v22 }
  0x80   : > { %1431 = vmatprep.subr.msk.bf16.mxu1 %vm1430_vm14, %v1607_v28  ;;  %vm1494_vm1 = vmpackc.low %vm415_vm10, %vm413_vm9  ;;  %vm416_vm10 = vcmp.eq.s32.totalorder %v274_v26, %v1710_v22  ;;  %vm418_vm14 = vcmp.eq.s32.totalorder %v275_v27, %v1710_v22  ;;  %v682_v22 = vld [vmem:[#allocation2 + $0x30] sm:$0xff]  ;;  %v937_v27 = vrot.slane %v927_v14, %v926_v3 }
  0x81   : > { %1495 = vmatprep.subr.msk.bf16.mxu0 %vm1494_vm1, %v1607_v28  ;;  %vm1432_vm4 = vmpackc.low %vm350_vm13, %vm348_vm12  ;;  %vm950_vm1 = vcmask 1041408  }
  0x82   : > { %1433 = vmatpush1.bf16.msk.msra.mxu1 %vm1432_vm4, %v1607_v28  ;;  %vm1496_vm6 = vmpackc.low %vm414_vm0, %vm412_vm15  ;;  %vm858_vm0 = vcmask 1043456  }
  0x83   : > { %1497 = vmatpush1.bf16.msk.msra.mxu0 %vm1496_vm6, %v1607_v28  ;;  %vm1434_vm9 = vmpackc.low %vm355_vm3, %vm353_vm2 }
  0x84   : > { %1435 = vmatprep.subr.msk.bf16.mxu1 %vm1434_vm9, %v1607_v28  ;;  %vm1498_vm12 = vmpackc.low %vm419_vm8, %vm417_vm5 }
  0x85   : > { %1499 = vmatprep.subr.msk.bf16.mxu0 %vm1498_vm12, %v1607_v28  ;;  %vm1436_vm13 = vmpackc.low %vm354_vm11, %vm352_vm7 }
  0x86   : > { %1437 = vmatpush1.bf16.msk.msra.mxu1 %vm1436_vm13, %v1607_v28  ;;  %vm1500_vm15 = vmpackc.low %vm418_vm14, %vm416_vm10 }
  0x87   : > { %1501 = vmatpush1.bf16.msk.msra.mxu0 %vm1500_vm15, %v1607_v28 }
  0x89   : > { %753 = vmatmul.mubr.f32.vlgmr.msra.gmra.mrb[0].mxu1 %v676_v23 }
  0x8a   : > { %836 = vmatmul.mubr.f32.vlgmr.msra.gmra.mrb[0].mxu0 %v678_v29  ;;  %758 = vmatprep.mubr.f32.mxu1 %v681_v30  ;;  %v941_v29 = vrot.slane %v931_v19, %v926_v3 }
  0x8b   : > { %841 = vmatprep.mubr.f32.mxu0 %v683_v31 }
  0x8d   : > { %759 = vmatmul.mubr.f32.gmra.mrb[2].mxu1 %v680_v32  ;;  %v971_v32 = vsub.s32 2, %v1697_v10 }
  0x8e   : > { %842 = vmatmul.mubr.f32.gmra.mrb[2].mxu0 %v682_v22  ;;  %764 = vmatprep.mubr.f32.mxu1 %v685_v33 }
  0x8f   : > { %847 = vmatprep.mubr.f32.mxu0 %v687_v34 }
  0x91   : > { %765 = vmatmul.mubr.f32.gmra.mrb[4].mxu1 %v684_v35 }
  0x92   : > { %848 = vmatmul.mubr.f32.gmra.mrb[4].mxu0 %v686_v36  ;;  %v975_v36 = vsub.s32 6, %v1697_v10 }
 0x15c   : > { %v754_v28 = vpop.f32.mrb[0].mxu1 }
 0x15d   : > { %v837_v38 = vpop.f32.mrb[0].mxu0  ;;  %v756_v39 = vpop.f32.mrb[1].mxu1 }
 0x15e   : > { %v838_v40 = vadd.f32 %v837_v38, %v754_v28  ;;  %v839_v41 = vpop.f32.mrb[1].mxu0 }
 0x15f   : > { %v840_v42 = vadd.f32 %v839_v41, %v756_v39  ;;  %v972_v41 = vrot.slane %v2030_v37, %v971_v32 }
 0x160   : > { %v760_v43 = vpop.f32.mrb[2].mxu1  ;;  %v859_v48 = vrot.slane %v838_v40, 4 }
 0x161   : > { %v843_v45 = vpop.f32.mrb[2].mxu0  ;;  %v762_v46 = vpop.f32.mrb[3].mxu1  ;;  %v860_v1 = vrot.slane %v840_v42, 4 }
 0x162   : > { %v844_v49 = vadd.f32 %v843_v45, %v760_v43  ;;  %v845_v50 = vpop.f32.mrb[3].mxu0  ;;  %v976_v45 = vrot.slane %v2030_v37, %v975_v36 }
 0x163   : > { %v846_v4 = vadd.f32 %v845_v50, %v762_v46  ;;  %v982_v50 = vrot.slane %v972_v41, %v971_v32 }
 0x164   : > { %v861_v51 = vrot.slane %v844_v49, 4  ;;  %v869_v52 = vsub.f32 %v844_v49, %v859_v48  ;;  %v766_v53 = vpop.f32.mrb[4].mxu1  ;;  %v986_v10 = vrot.slane %v976_v45, %v971_v32 }
 0x165   : > { %v863_v55 = vrot.slane %v846_v4, 4  ;;  %v870_v56 = vsub.f32 %v846_v4, %v860_v1  ;;  %v849_v57 = vpop.f32.mrb[4].mxu0  ;;  %v768_v58 = vpop.f32.mrb[5].mxu1 }
 0x166   : > { %v850_v60 = vadd.f32 %v849_v57, %v766_v53  ;;  %v862_v15 = vsel %vm858_vm0, %v859_v48, %v861_v51  ;;  %v851_v61 = vpop.f32.mrb[5].mxu0  ;;  %v892_v2 = vmul.f32 %v887_v54, %v869_v52 }
 0x167   : > { %v852_v62 = vadd.f32 %v851_v61, %v768_v58  ;;  %v864_v63 = vsel %vm858_vm0, %v860_v1, %v863_v55  ;;  %v893_v6 = vmul.f32 %v891_v59, %v870_v56 }
 0x168   : > { %v871_v0 = vsub.f32 %v850_v60, %v862_v15  ;;  %v900_v11 = vrot.slane %v892_v2, 4 }
 0x169   : > { %v872_v5 = vsub.f32 %v852_v62, %v864_v63  ;;  %v903_v13 = vrot.slane %v893_v6, 4 }
 0x16a   : > { %v894_v7 = vmul.f32 %v887_v54, %v871_v0 }
 0x16b   : > { %v895_v9 = vmul.f32 %v891_v59, %v872_v5 }
 0x16c   : > { %v901_v12 = vrot.slane %v894_v7, 4 }
 0x16d   : > { %v904_v16 = vrot.slane %v895_v9, 4 }
 0x16e   : > { %v902_v17 = vsel %vm858_vm0, %v900_v11, %v901_v12  ;;  %v912_v18 = vadd.f32 %v901_v12, %v844_v49 }
 0x16f   : > { %v910_v20 = vadd.f32 %v902_v17, %v838_v40  ;;  %v905_v21 = vsel %vm858_vm0, %v903_v13, %v904_v16  ;;  %v913_v24 = vadd.f32 %v904_v16, %v846_v4 }
 0x170   : > { %v911_v25 = vadd.f32 %v905_v21, %v840_v42 }
 0x171   : > { %v916_v26 = vrot.slane %v910_v20, 2 }
 0x172   : > { %v917_v23 = vrot.slane %v911_v25, 2 }
 0x173   : > { %v920_v30 = vsub.f32 %v910_v20, %v916_v26  ;;  %v922_v31 = vsub.f32 %v912_v18, %v916_v26 }
 0x174   : > { %v921_v22 = vsub.f32 %v911_v25, %v917_v23  ;;  %v923_v33 = vsub.f32 %v913_v24, %v917_v23 }
 0x175   : > { %v942_v34 = vmul.f32 %v937_v27, %v920_v30  ;;  %v944_v35 = vmul.f32 %v937_v27, %v922_v31 }
 0x176   : > { %v943_v28 = vmul.f32 %v941_v29, %v921_v22  ;;  %v945_v38 = vmul.f32 %v941_v29, %v923_v33 }
 0x177   : > { %v951_v39 = vrot.slane %v942_v34, 6  ;;  %v952_v40 = vrot.slane %v944_v35, 6 }
 0x178   : > { %v954_v42 = vrot.slane %v943_v28, 6  ;;  %v955_v43 = vrot.slane %v945_v38, 6 }
 0x179   : > { %v953_v44 = vsel %vm950_vm1, %v951_v39, %v952_v40 }
 0x17a   : > { %v959_v46 = vadd.f32 %v953_v44, %v910_v20  ;;  %v956_v47 = vsel %vm950_vm1, %v954_v42, %v955_v43 }
 0x17b   : > { %v960_v48 = vadd.f32 %v956_v47, %v911_v25 }
 0x17c   : > { %v963_v49 = vrot.slane %v959_v46, 5 }
 0x17d   : > { %v964_v1 = vrot.slane %v960_v48, 5 }
 0x17e   : > { %v967_v4 = vsub.f32 %v959_v46, %v963_v49 }
 0x17f   : > { %v968_v51 = vsub.f32 %v960_v48, %v964_v1 }
 0x180   : > { %v987_v52 = vmul.f32 %v982_v50, %v967_v4 }
 0x181   : > { %v988_v53 = vmul.f32 %v986_v10, %v968_v51 }
 0x182   : > { %v991_v54 = vrot.slane %v987_v52, 3 }
 0x183   : > { %v992_v55 = vrot.slane %v988_v53, 3 }
 0x184   : > { %v995_v56 = vadd.f32 %v991_v54, %v959_v46 }
 0x185   : > { %v996_v57 = vadd.f32 %v992_v55, %v960_v48 }
 0x187   : > { %v999_v37 = vcombine.low %v995_v56, %v996_v57 }
 0x189   : > { %1001 = vst [vmem:[%s196_s12] sm:$0x77] %v999_v37 }
 0x18a PF: > { %s13_s11 = sadd.s32 1, %s1602_s11   ;;  %s2076_s9 = smov %s1598_s10 }
 0x18b   : > { %p10_p4 = scmp.ge.s32.totalorder %s13_s11, 4   ;;  %s2077_s10 = smov %s2079_s13 }
 0x18d   :  { %12 = sbr.rel (!%p10_p4) target bundleno = 2 (0x2), region = 63 }
 0x194   :  { %1032 = vsyncpa [#allocation3], 1 }
 0x195   :  { %1034 = vsyncpa [#allocation3 + $0x1], 1 }

</bundles_post_ra>
